<compile_context>
chip_gen: v5e
topology: v5e:2x2
jax: 0.10.0
libtpu: 0.0.40
codegen_flags: <defaults>
</compile_context>

<pallas_src>
import jax
import jax.numpy as jnp
import numpy as np
from jax.experimental import pallas as pl
from jax.experimental.pallas import tpu as pltpu

# ----------------------------- config ---------------------------------------
D_MODEL = 32        # config.d_model
D_FF = 64           # config.d_ff
LN_EPS = 1e-6       # config.layer_norm_epsilon
N_HEADS = 4         # only used to shape the pass-through position bias


# ----------------------------- Pallas kernel --------------------------------
def _t5_ff_kernel(x_ref, wln_ref, wi_ref, wo_ref, o_ref):
    # x_ref:  (R, D)    a block of flattened (batch*seq) rows
    # wln_ref:(1, D)    T5LayerNorm weight
    # wi_ref: (D, d_ff) first FF projection (no bias)
    # wo_ref: (d_ff, D) second FF projection (no bias)
    # o_ref:  (R, D)    output block (residual already added)
    x = x_ref[...].astype(jnp.float32)                       # (R, D)

    # --- T5LayerNorm (RMS norm: no mean subtraction, no bias) ---
    var = jnp.mean(x * x, axis=-1, keepdims=True)
    normed = x * jax.lax.rsqrt(var + LN_EPS)
    normed = normed * wln_ref[...].astype(jnp.float32)       # (1, D) broadcast

    # --- DenseReluDense: wi -> ReLU -> (dropout=identity) -> wo ---
    h = jnp.dot(normed, wi_ref[...], preferred_element_type=jnp.float32)
    h = jnp.maximum(h, 0.0)
    y = jnp.dot(h, wo_ref[...], preferred_element_type=jnp.float32)

    # --- residual add (outer dropout = identity in eval) ---
    o_ref[...] = (x + y).astype(o_ref.dtype)


def t5_layer_ff(hidden, wln, wi, wo):
    """hidden: (B, S, D). Returns (B, S, D) = hidden + FF(LayerNorm(hidden))."""
    B, S, D = hidden.shape
    d_ff = wi.shape[1]
    rows = B * S

    # fold batch & sequence into one row axis (feedback: collapse the batch grid)
    x2d = hidden.reshape(rows, D)
    pad = (-rows) % 8                       # sublane-align the row axis
    if pad:
        x2d = jnp.pad(x2d, ((0, pad), (0, 0)))
    total = rows + pad

    # split into exactly two parallel row blocks when possible (v7x: 2 TCs);
    # otherwise do everything in one grid step.
    if total >= 16 and total % 16 == 0:
        block_rows = total // 2
    else:
        block_rows = total
    grid = (total // block_rows,)

    wln2d = wln.reshape(1, D)

    out2d = pl.pallas_call(
        _t5_ff_kernel,
        out_shape=jax.ShapeDtypeStruct((total, D), hidden.dtype),
        grid_spec=pl.GridSpec(
            grid=grid,
            in_specs=[
                pl.BlockSpec((block_rows, D), lambda i: (i, 0)),
                pl.BlockSpec((1, D), lambda i: (0, 0)),       # weights: constant
                pl.BlockSpec((D, d_ff), lambda i: (0, 0)),    # block index ->
                pl.BlockSpec((d_ff, D), lambda i: (0, 0)),    # VMEM-resident
            ],
            out_specs=pl.BlockSpec((block_rows, D), lambda i: (i, 0)),
        ),
        compiler_params=pltpu.CompilerParams(
            dimension_semantics=("parallel",)),
    )(x2d, wln2d, wi, wo)

    return out2d[:rows].reshape(B, S, D)


# ---------------------- SwitchEncoderLayerFFPipe forward --------------------
def switch_encoder_layer_ff_pipe(params,
                                 encoder_hidden_states,
                                 encoder_position_bias,
                                 extended_encoder_attention_mask,
                                 decoder_input_ids,
                                 decoder_attention_mask,
                                 encoder_attention_mask):
    new_hidden = t5_layer_ff(encoder_hidden_states,
                             params["wln"], params["wi"], params["wo"])
    return (new_hidden, encoder_position_bias,
            extended_encoder_attention_mask, decoder_input_ids,
            decoder_attention_mask, encoder_attention_mask)


# ------------------------------ reference -----------------------------------
def _reference(params, hidden):
    x = hidden.astype(jnp.float32)
    var = jnp.mean(x * x, axis=-1, keepdims=True)
    normed = x * jax.lax.rsqrt(var + LN_EPS) * params["wln"]
    h = jnp.maximum(normed @ params["wi"], 0.0)
    return x + h @ params["wo"]


# ------------------------------ main -----------------------------------------
if __name__ == "__main__":
    B, S = 2, 8
    T = 8  # decoder seq length (pass-through tensors only)

    key = jax.random.PRNGKey(0)
    keys = jax.random.split(key, 8)
    params = {
        "wln": 1.0 + 0.1 * jax.random.normal(keys[0], (D_MODEL,), jnp.float32),
        "wi": 0.05 * jax.random.normal(keys[1], (D_MODEL, D_FF), jnp.float32),
        "wo": 0.05 * jax.random.normal(keys[2], (D_FF, D_MODEL), jnp.float32),
    }

    encoder_hidden_states = jax.random.normal(keys[3], (B, S, D_MODEL),
                                              jnp.float32)
    encoder_position_bias = 0.02 * jax.random.normal(
        keys[4], (1, N_HEADS, S, S), jnp.float32)
    encoder_attention_mask = jnp.ones((B, S), jnp.int32).at[1, S - 2:].set(0)
    extended_encoder_attention_mask = (
        (1.0 - encoder_attention_mask[:, None, None, :].astype(jnp.float32))
        * -1e9)                                          # (B, 1, 1, S)
    decoder_input_ids = jax.random.randint(keys[5], (B, T), 0, 100, jnp.int32)
    decoder_attention_mask = jnp.ones((B, T), jnp.int32)

    outs = switch_encoder_layer_ff_pipe(
        params, encoder_hidden_states, encoder_position_bias,
        extended_encoder_attention_mask, decoder_input_ids,
        decoder_attention_mask, encoder_attention_mask)
    outs = jax.block_until_ready(outs)

    new_hidden = outs[0]
    ref = _reference(params, encoder_hidden_states)
    np.testing.assert_allclose(np.asarray(new_hidden), np.asarray(ref),
                               rtol=1e-5, atol=1e-5)

    # pass-through outputs must be unchanged
    np.testing.assert_array_equal(np.asarray(outs[1]),
                                  np.asarray(encoder_position_bias))
    np.testing.assert_array_equal(np.asarray(outs[2]),
                                  np.asarray(extended_encoder_attention_mask))
    np.testing.assert_array_equal(np.asarray(outs[3]),
                                  np.asarray(decoder_input_ids))
    np.testing.assert_array_equal(np.asarray(outs[4]),
                                  np.asarray(decoder_attention_mask))
    np.testing.assert_array_equal(np.asarray(outs[5]),
                                  np.asarray(encoder_attention_mask))

    print("KERNEL_OK")
</pallas_src>

<mosaic_0001>
module attributes {stable_mosaic.version = 11 : i64} {
  func.func @_t5_ff_kernel(%arg0: i32, %arg1: memref<8x32xf32, #tpu.memory_space<vmem>>, %arg2: memref<1x32xf32, #tpu.memory_space<vmem>>, %arg3: memref<32x64xf32, #tpu.memory_space<vmem>>, %arg4: memref<64x32xf32, #tpu.memory_space<vmem>>, %arg5: memref<8x32xf32, #tpu.memory_space<vmem>>) attributes {dimension_semantics = [#tpu.dimension_semantics<parallel>], iteration_bounds = array<i64: 2>, scalar_prefetch = 0 : i64, scratch_operands = 0 : i64, tpu.core_type = #tpu.core_type<tc>, window_params = [{transform_indices = @transform_0, window_bounds = array<i64: 8, 32>}, {pipeline_mode = #tpu.pipeline_mode<synchronous>, transform_indices = @transform_1, window_bounds = array<i64: 1, 32>}, {pipeline_mode = #tpu.pipeline_mode<synchronous>, transform_indices = @transform_2, window_bounds = array<i64: 32, 64>}, {pipeline_mode = #tpu.pipeline_mode<synchronous>, transform_indices = @transform_3, window_bounds = array<i64: 64, 32>}, {transform_indices = @transform_4, window_bounds = array<i64: 8, 32>}]} {
    %c0 = arith.constant 0 : index
    %c0_0 = arith.constant 0 : index
    %0 = vector.load %arg1[%c0, %c0_0] : memref<8x32xf32, #tpu.memory_space<vmem>>, vector<8x32xf32>
    %1 = arith.mulf %0, %0 : vector<8x32xf32>
    %cst = arith.constant dense<0.000000e+00> : vector<8xf32>
    %2 = vector.multi_reduction <add>, %1, %cst [1] : vector<8x32xf32> to vector<8xf32>
    %3 = vector.shape_cast %2 : vector<8xf32> to vector<8x1xf32>
    %cst_1 = arith.constant 3.200000e+01 : f32
    %4 = vector.broadcast %cst_1 : f32 to vector<8x1xf32>
    %5 = arith.divf %3, %4 : vector<8x1xf32>
    %cst_2 = arith.constant 9.99999997E-7 : f32
    %6 = vector.broadcast %cst_2 : f32 to vector<8x1xf32>
    %7 = arith.addf %5, %6 : vector<8x1xf32>
    %8 = math.rsqrt %7 : vector<8x1xf32>
    %9 = vector.broadcast %8 : vector<8x1xf32> to vector<8x32xf32>
    %10 = arith.mulf %0, %9 : vector<8x32xf32>
    %c0_3 = arith.constant 0 : index
    %c0_4 = arith.constant 0 : index
    %11 = vector.load %arg2[%c0_3, %c0_4] : memref<1x32xf32, #tpu.memory_space<vmem>>, vector<1x32xf32>
    %12 = vector.broadcast %11 : vector<1x32xf32> to vector<8x32xf32>
    %13 = arith.mulf %10, %12 : vector<8x32xf32>
    %c0_5 = arith.constant 0 : index
    %c0_6 = arith.constant 0 : index
    %14 = vector.load %arg3[%c0_5, %c0_6] : memref<32x64xf32, #tpu.memory_space<vmem>>, vector<32x64xf32>
    %cst_7 = arith.constant dense<0.000000e+00> : vector<8x64xf32>
    %15 = tpu.matmul %13, %14, %cst_7 {dimension_numbers = #tpu.dot_dimension_numbers<[1], [0], [0], [1], [0, 0, 1, 1], [], []>} : vector<8x32xf32>, vector<32x64xf32>, vector<8x64xf32> -> vector<8x64xf32>
    %cst_8 = arith.constant 0.000000e+00 : f32
    %16 = vector.broadcast %cst_8 : f32 to vector<8x64xf32>
    %17 = arith.maximumf %15, %16 : vector<8x64xf32>
    %c0_9 = arith.constant 0 : index
    %c0_10 = arith.constant 0 : index
    %18 = vector.load %arg4[%c0_9, %c0_10] : memref<64x32xf32, #tpu.memory_space<vmem>>, vector<64x32xf32>
    %cst_11 = arith.constant dense<0.000000e+00> : vector<8x32xf32>
    %19 = tpu.matmul %17, %18, %cst_11 {dimension_numbers = #tpu.dot_dimension_numbers<[1], [0], [0], [1], [0, 0, 1, 1], [], []>} : vector<8x64xf32>, vector<64x32xf32>, vector<8x32xf32> -> vector<8x32xf32>
    %20 = arith.addf %0, %19 : vector<8x32xf32>
    %c0_12 = arith.constant 0 : index
    %c0_13 = arith.constant 0 : index
    %21 = vector.load %arg5[%c0_12, %c0_13] : memref<8x32xf32, #tpu.memory_space<vmem>>, vector<8x32xf32>
    tpu.vector_store %arg5[%c0_12, %c0_13], %20 {strides = array<i32>} : memref<8x32xf32, #tpu.memory_space<vmem>>, vector<8x32xf32>,
    return
  }
  func.func @transform_0(%arg0: i32) -> (i32, i32) {
    %c0_i32 = arith.constant 0 : i32
    %c0_i32_0 = arith.constant 0 : i32
    return %arg0, %c0_i32 : i32, i32
  }
  func.func @transform_1(%arg0: i32) -> (i32, i32) {
    %c0_i32 = arith.constant 0 : i32
    %c0_i32_0 = arith.constant 0 : i32
    %c0_i32_1 = arith.constant 0 : i32
    return %c0_i32, %c0_i32_0 : i32, i32
  }
  func.func @transform_2(%arg0: i32) -> (i32, i32) {
    %c0_i32 = arith.constant 0 : i32
    %c0_i32_0 = arith.constant 0 : i32
    %c0_i32_1 = arith.constant 0 : i32
    return %c0_i32, %c0_i32_0 : i32, i32
  }
  func.func @transform_3(%arg0: i32) -> (i32, i32) {
    %c0_i32 = arith.constant 0 : i32
    %c0_i32_0 = arith.constant 0 : i32
    %c0_i32_1 = arith.constant 0 : i32
    return %c0_i32, %c0_i32_0 : i32, i32
  }
  func.func @transform_4(%arg0: i32) -> (i32, i32) {
    %c0_i32 = arith.constant 0 : i32
    %c0_i32_0 = arith.constant 0 : i32
    return %arg0, %c0_i32 : i32, i32
  }
}

</mosaic_0001>

<bundles_post_ra>
// kernel: tpu_custom_call.1
= control target key start
LH: loop header
LB: loop body
LE: loop exit
PB: predicated region body
PF: predicated region fallthrough
CT: control target
= control target key end

     0   :  { %9 = vsyncpa [#allocation3], 0  ;;  %s641_s0 = inlined_call_operand.vmem [shape: f32[16,32], index: 0, kind: input, shape index: {}]   ;;  %s642_s1 = inlined_call_operand.vmem [shape: f32[1,32], index: 1, kind: input, shape index: {}]   ;;  %s643_s2 = inlined_call_operand.vmem [shape: f32[32,64], index: 2, kind: input, shape index: {}]   ;;  %s644_s3 = inlined_call_operand.vmem [shape: f32[64,32], index: 3, kind: input, shape index: {}]   ;;  %s645_s4 = inlined_call_operand.hbm [shape: f32[16,32], index: 4, kind: output, shape index: {}]  }
   0x1   :  { %11 = vsyncpa [#allocation3 + $0x1], 0  ;;  %s508_s15 = smov 0   ;;  %s510_s16 = smov 0  }
   0x2   :  { %s512_s17 = smov 0   ;;  %s514_s18 = smov 0  }
   0x3 LB: > { %s529_s19 = sadd.s32 4294967295, %s480_s18   ;;  %s361_s20 = sadd.s32 4294967294, %s480_s18   ;;  %s480_s18 = sphi %s514_s18, %s651_s18   ;;  %s476_s17 = sphi %s512_s17, %s650_s17   ;;  %s472_s16 = sphi %s510_s16, %s649_s16   ;;  %s468_s15 = sphi %s508_s15, %s648_s15  }
   0x4   : > { %s533_s21 = sadd.s32 1, %s480_s18   ;;  %s113_s22 = sadd.s32 1, %s476_s17 }
   0x5   : > { %s110_s23 = ssub.s32 %s480_s18, %s533_s21  ;;  %p123_p0 = scmp.ne.s32.totalorder %s476_s17, %s472_s16 }
   0x6   : > { %p111_p1 = scmp.eq.s32.totalorder %s110_s23, 0  ;;  %p124_p2 = scmp.eq.s32.totalorder %s529_s19, 1 }
   0x7   : > { %p129_p3 = scmp.ne.s32.totalorder %s472_s16, %s468_s15  ;;  %p130_p4 = scmp.eq.s32.totalorder %s361_s20, 1 }
   0x8   : > { %s544_s24 = scalar_select %p111_p1, %s476_s17, %s113_s22  }
   0x9   : > { %p546_p5 = por %p124_p2, %p123_p0  ;;  %p550_p6 = por %p130_p4, %p129_p3 }
   0xa   : > { %p364_p7 = scmp.ge.s32.totalorder %s480_s18, 1  ;;  %p164_p8 = scmp.lt.s32.totalorder %s480_s18, 3 }
   0xc   : > { %p165_p9 = pnand %p364_p7, %p164_p8 }
   0xd   : > { %p189_p10 = scmp.lt.s32.totalorder (!%p165_p9), %s529_s19, 1  ;;  %s186_s20 = sand.u32 (!%p165_p9), 1, %s472_s16  }
   0xe   : > { %168 = sbr.rel (%p165_p9) target bundleno = 428 (0x1ac), region = 36  ;;  %s365_s22 = sshll.u32 (!%p165_p9), %s186_s20, 3 }
   0xf   : > { %s370_s23 = sshll.u32 (!%p165_p9), %s529_s19, 3  ;;  %s188_s30 = scalar_lea.vmem (!%p165_p9), [#allocation2], %s365_s22 }
  0x10   : > { %s297_s29 = scalar_lea.hbm (!%p165_p9), %s645_s4, %s370_s23  ;;  %s287_s7 = scalar_lea.sflag (!%p165_p9), [#allocation3], %s186_s20 }
  0x11   : > { %s301_s6 = sshll.u32 (!%p165_p9), %s297_s29, 4  ;;  %s438_s11 = scalar_lea.hbm (!%p165_p9), %s645_s4, 16  ;;  %s302_s6 = int_to_ptr.hbm [resolvable:$true] %s301_s6 }
  0x12   : > { %s432_s8 = sshra.s32 (!%p165_p9), %s302_s6, 4  ;;  %s433_s8 = int_to_ptr.hbm [resolvable:$true] %s432_s8 }
  0x13   : > { %s190_s27 = scalar_select %p189_p10, %s529_s19, 1  ;;  %vm195_vm0 = vcmask 261120   ;;  %v482_v3 = vmov 32.0   ;;  %v227_v7 = vld [vmem:[%s643_s2 + $0x18] sm:$0xff]  ;;  %v226_v8 = vld [vmem:[%s643_s2 + $0x10] sm:$0xff]  ;;  %v225_v9 = vld [vmem:[%s643_s2 + $0x8] sm:$0xff] }
  0x14   : > { %414 = vrcp.f32 %v482_v3  ;;  %243 = vmatpush.msra.mxu0 %v227_v7  ;;  %v224_v11 = vld [vmem:[%s643_s2] sm:$0xff]  ;;  %v259_v13 = vld [vmem:[%s644_s3 + $0x38] sm:$0xff]  ;;  %v258_v14 = vld [vmem:[%s644_s3 + $0x30] sm:$0xff]  ;;  %vm260_vm5 = vcmask 523264   ;;  %s434_s9 = scalar_lea.hbm %s433_s8, 8  ;;  %p439_p0 = scmp.lt.s32.totalorder %s433_s8, %s645_s4 }
  0x15   : > { %s366_s28 = sshll.u32 %s190_s27, 3  ;;  %272 = vmatpush.msra.mxu1 %v259_v13  ;;  %v257_v15 = vld [vmem:[%s644_s3 + $0x28] sm:$0xff]  ;;  %v256_v17 = vld [vmem:[%s644_s3 + $0x20] sm:$0xff]  ;;  %v255_v20 = vld [vmem:[%s644_s3 + $0x18] sm:$0xff]  ;;  %p435_p11 = scmp.ne.s32.totalorder %s433_s8, %s434_s9 }
  0x16   : > { %s192_s5 = scalar_lea.vmem %s641_s0, %s366_s28  ;;  %244 = vmatpush.msra.mxu0 %v226_v8  ;;  %v254_v22 = vld [vmem:[%s644_s3 + $0x10] sm:$0xff]  ;;  %v413_v29 = vld [vmem:[%s642_s1] ss:$0 sm:$0xff]  ;;  %v253_v33 = vld [vmem:[%s644_s3 + $0x8] sm:$0xff]  ;;  %p440_p1 = scmp.lt.s32.totalorder %s438_s11, %s434_s9 }
  0x17   : > { %v561_v0 = vld [vmem:[%s192_s5] sm:$0xff]  ;;  %273 = vmatpush.msra.mxu1 %v258_v14  ;;  %s299_s5 = sshll.u32 %s188_s30, 4  ;;  %p436_p12 = pnand %p435_p11, %p546_p5  ;;  %s300_s5 = int_to_ptr.vmem [resolvable:$true] %s299_s5 }
  0x18   : > { %v194_v1 = vmul.f32 %v561_v0, %v561_v0  ;;  %245 = vmatpush.msra.mxu0 %v225_v9  ;;  %v252_v34 = vld [vmem:[%s644_s3] sm:$0xff]  ;;  %p441_p2 = por %p440_p1, %p439_p0 }
  0x19   : > { %274 = vmatpush.msra.mxu1 %v257_v15  ;;  %p437_p13 = pneg %p436_p12 }
  0x1a   : > { %v196_v2 = vsel %vm195_vm0, %v194_v1, 0.0  ;;  %v415_v4 = vpop.eup %414  ;;  %246 = vmatpush.msra.mxu0 %v224_v11 }
  0x1b   : > { %197 = vadd.xlane.f32.xlu0 %v196_v2  ;;  %v200_v5 = vmul.f32 32.0, %v415_v4  ;;  %vm204_vm1 = vweird.f32 %v415_v4  ;;  %275 = vmatpush.msra.mxu1 %v256_v17  ;;  %p442_p3 = pnand %p441_p2, %p437_p13 }
  0x1d   : > { %v201_v6 = vsub.f32 1.0, %v200_v5  ;;  %276 = vmatpush.msra.mxu1 %v255_v20 }
  0x1f   : > { %v202_v10 = vmul.f32 %v415_v4, %v201_v6  ;;  %277 = vmatpush.msra.mxu1 %v254_v22 }
  0x21   : > { %v203_v12 = vadd.f32 %v415_v4, %v202_v10  ;;  %278 = vmatpush.msra.mxu1 %v253_v33 }
  0x23   : > { %v205_v16 = vsel %vm204_vm1, %v415_v4, %v203_v12  ;;  %279 = vmatpush.msra.mxu1 %v252_v34 }
  0x8e   : > { %v198_v18 = vpop.xlane.xlu0 %197 }
  0x8f   : > { %v206_v19 = vmul.f32 %v205_v16, %v198_v18 }
  0x91   : > { %v207_v21 = vadd.f32 1e-06, %v206_v19 }
  0x93   : > { %416 = vrsqrt.f32 %v207_v21  ;;  %vm214_vm3 = vweird.f32 %v207_v21 }
  0x99   : > { %v417_v23 = vpop.eup %416 }
  0x9a   : > { %v209_v24 = vmul.f32 %v417_v23, %v207_v21  ;;  %vm215_vm2 = vweird.f32 %v417_v23 }
  0x9b   : > { %vm216_vm4 = vmor %vm214_vm3, %vm215_vm2 }
  0x9c   : > { %v210_v25 = vmul.f32 %v417_v23, %v209_v24 }
  0x9e   : > { %v211_v26 = vmul.f32 0.5, %v210_v25 }
  0xa0   : > { %v212_v27 = vsub.f32 1.5, %v211_v26 }
  0xa2   : > { %v213_v28 = vmul.f32 %v417_v23, %v212_v27 }
  0xa4   : > { %v217_v30 = vsel %vm216_vm4, %v417_v23, %v213_v28 }
  0xa5   : > { %v218_v31 = vmul.f32 %v217_v30, %v561_v0 }
  0xa7   : > { %v223_v32 = vmul.f32 %v413_v29, %v218_v31 }
  0xa9   : > { %367 = vmatmul.msk.f32.vlgmr.msra.gmra.mxu0 %vm195_vm0, %v223_v32 }
 0x126   : > { %v248_v35 = vpop.f32.mrf.mxu0 }
 0x127   : > { %v251_v36 = vmax.f32 %v248_v35, 0.0 }
 0x129   : > { %368 = vmatmul.msk.f32.vlgmr.msra.gmra.mxu1 %vm260_vm5, %v251_v36 }
 0x1a6   : > { %v281_v37 = vpop.f32.mrf.mxu1 }
 0x1a7   : > { %v284_v38 = vadd.f32 %v281_v37, %v561_v0 }
 0x1a9   : > { %285 = vst.msk [vmem:[%s188_s30] sm:$0xff] %vm195_vm0, %v284_v38 }
 0x1aa   : > { %445 = shalt.err (!%p442_p3)
}
 0x1ab   : > { %373 = dma.vmem_to_hbm [thread:$0]  (%p546_p5), %s300_s5, 128, %s302_s6, %s287_s7  }
 0x1ac PF: > { %p379_p4 = scmp.ge.s32.totalorder %s480_s18, 2  ;;  %s313_s14 = sand.u32 1, %s468_s15  }
 0x1ad   : > { %s314_s20 = scalar_lea.sflag [#allocation3], %s313_s14 }
 0x1ae   : > { %p376_p7 = pnand %p379_p4, %p550_p6 }
 0x1b0   : > { %p377_p8 = pneg %p376_p7 }
 0x1b2   : > { %463 = dma.done.wait (%p377_p8), %s314_s20, 128  }
 0x1b3   : > { %465 = vsyncadd (%p377_p8), %s314_s20, 4294967168  ;;  %p14_p9 = scmp.ge.s32.totalorder %s533_s21, 4   ;;  %s648_s15 = smov %s472_s16 }
 0x1b4   : > { %s649_s16 = smov %s476_s17  ;;  %s650_s17 = smov %s544_s24 }
 0x1b5   : > { %s651_s18 = smov %s533_s21  ;;  %16 = sbr.rel (!%p14_p9) target bundleno = 3 (0x3), region = 71 }
 0x1ba   :  { %320 = vsyncpa [#allocation3], 1 }
 0x1bb   :  { %322 = vsyncpa [#allocation3 + $0x1], 1 }

</bundles_post_ra>
